<compile_context>
chip_gen: v7x
topology: tpu7x:2x2x1
jax: 0.10.0
libtpu: 0.0.40
codegen_flags: <defaults>
</compile_context>

<pallas_src>
import functools

import jax
import jax.numpy as jnp
from jax.experimental import pallas as pl
from jax.experimental.pallas import tpu as pltpu


def _round_up(x, m):
    return ((x + m - 1) // m) * m


# ----------------------------- Pallas kernel ------------------------------- #

def _gated_conv_kernel(pT_ref, w_ref, b_ref, o_ref, acc_ref, *, coutp,
                       activation):
    # pT_ref : (tk, tm)        bf16  im2col patches, K-major (transposed)
    # w_ref  : (2*Coutp, tk)   bf16  [Wh ; Wg] flattened conv weights, K tile
    # b_ref  : (2*Coutp, 1)    f32   [bh ; bg]
    # o_ref  : (Coutp, tm)     out_dtype  gated output tile
    # acc_ref: (2*Coutp, tm)   f32   VMEM accumulator (persists across k)
    k = pl.program_id(1)

    @pl.when(k == 0)
    def _():
        acc_ref[...] = jnp.zeros_like(acc_ref)

    acc_ref[...] += jnp.dot(w_ref[...], pT_ref[...],
                            preferred_element_type=jnp.float32)

    @pl.when(k == pl.num_programs(1) - 1)
    def _():
        y = acc_ref[...] + b_ref[...]            # lane-broadcast bias
        h = y[:coutp, :]
        g = y[coutp:, :]
        if activation == "tanh":
            h = jnp.tanh(h)
        elif activation == "relu":
            h = jnp.maximum(h, 0.0)
        # activation is None -> identity (matches the PyTorch module default)
        gate = pl.reciprocal(1.0 + jnp.exp(-g), approx=True)   # sigmoid on EUP
        o_ref[...] = (h * gate).astype(o_ref.dtype)


def _gated_matmul(pT, w_cat, b_cat, *, coutp, activation, tm, tk, out_dtype,
                  vmem_limit_bytes):
    Kp, Mp = pT.shape
    two_coutp = w_cat.shape[0]
    assert Mp % tm == 0 and Kp % tk == 0, (Mp, tm, Kp, tk)
    grid = (Mp // tm, Kp // tk)

    flops = 2 * Mp * Kp * two_coutp
    transcendentals = Mp * coutp * (3 if activation == "tanh" else 2)
    bytes_accessed = (pT.size * pT.dtype.itemsize
                      + grid[0] * w_cat.size * w_cat.dtype.itemsize
                      + b_cat.size * 4
                      + Mp * coutp * jnp.dtype(out_dtype).itemsize)

    return pl.pallas_call(
        functools.partial(_gated_conv_kernel, coutp=coutp,
                          activation=activation),
        out_shape=jax.ShapeDtypeStruct((coutp, Mp), out_dtype),
        grid_spec=pltpu.PrefetchScalarGridSpec(
            num_scalar_prefetch=0,
            grid=grid,
            in_specs=[
                pl.BlockSpec((tk, tm), lambda i, k: (k, i)),
                pl.BlockSpec((two_coutp, tk), lambda i, k: (0, k)),
                pl.BlockSpec((two_coutp, 1), lambda i, k: (0, 0)),
            ],
            out_specs=pl.BlockSpec((coutp, tm), lambda i, k: (0, i)),
            scratch_shapes=[pltpu.VMEM((two_coutp, tm), jnp.float32)],
        ),
        compiler_params=pltpu.CompilerParams(
            dimension_semantics=("parallel", "arbitrary"),
            vmem_limit_bytes=vmem_limit_bytes),
        cost_estimate=pl.CostEstimate(flops=flops,
                                      transcendentals=transcendentals,
                                      bytes_accessed=bytes_accessed),
    )(pT, w_cat, b_cat)


# ------------------------------- Glue (JAX) -------------------------------- #

def _im2col_3d_T(x, kernel_size, stride, padding, dilation, compute_dtype):
    """x: (N, Cin, D, H, W) -> patches_T (kd*kh*kw*Cin, N*Do*Ho*Wo).

    K rows are TAP-major with channels innermost (r = t*Cin + c); the wrapper
    permutes the (tiny) weights to match, which removes the extra kd*kh*kw-x
    transpose pass the old channel-major layout needed.  All shuffles are bf16."""
    kd, kh, kw = kernel_size
    sd, sh, sw = stride
    pd, ph, pw = padding
    dd, dh, dw = dilation
    N, Cin, D, H, W = x.shape

    x = x.astype(compute_dtype)                      # bf16: 2x less HBM traffic
    xp = jnp.pad(x, ((0, 0), (0, 0), (pd, pd), (ph, ph), (pw, pw)))
    Dp, Hp, Wp = D + 2 * pd, H + 2 * ph, W + 2 * pw
    Do = (Dp - dd * (kd - 1) - 1) // sd + 1
    Ho = (Hp - dh * (kh - 1) - 1) // sh + 1
    Wo = (Wp - dw * (kw - 1) - 1) // sw + 1

    xt = xp.transpose(1, 0, 2, 3, 4)                 # (Cin, N, Dp, Hp, Wp)
    slices = []
    for zd in range(kd):
        for zh in range(kh):
            for zw in range(kw):
                slices.append(xt[:, :,
                                 zd * dd: zd * dd + sd * Do: sd,
                                 zh * dh: zh * dh + sh * Ho: sh,
                                 zw * dw: zw * dw + sw * Wo: sw])
    stacked = jnp.stack(slices, axis=0)              # (T, Cin, N, Do, Ho, Wo)
    pT = stacked.reshape(kd * kh * kw * Cin, N * Do * Ho * Wo)
    return pT, (N, Do, Ho, Wo)


def _vmem_budget():
    """(tile_budget_bytes, vmem_limit_bytes) derived from this chip's VMEM."""
    cap = 64 * 1024 * 1024          # conservative fallback = v7x physical VMEM
    try:
        info = pltpu.get_tpu_info()
        cap = int(getattr(info, "vmem_capacity_bytes", cap)) or cap
    except Exception:               # non-TPU backend / query not available
        pass
    return int(cap * 0.45), int(cap * 0.70)


def _choose_tiles(M, K, coutp, out_itemsize, budget_bytes, tm=None, tk=None):
    """Pick (tm, tk, Mp, Kp): the largest {2048..128} tiles that fit the
    double-buffered VMEM budget, with M padded only to a multiple of 256 and
    small odd M-block counts (1, 3) made even for v7x megacore balance."""
    user_tm = tm is not None
    kp0 = _round_up(K, 128)
    mp = _round_up(M, 256)

    def footprint(t_m, t_k):
        patches = 2 * t_k * t_m * 2                  # bf16 patch tile, 2 bufs
        weights = 2 * (2 * coutp) * t_k * 2          # bf16 weight tile, 2 bufs
        bias = 2 * (2 * coutp) * 4
        outs = 2 * coutp * t_m * out_itemsize        # output tile, 2 bufs
        acc = (2 * coutp) * t_m * 4                  # f32 accumulator scratch
        return patches + weights + bias + outs + acc + (1 << 17)

    if tm is None or tk is None:
        tm_cands = [t for t in (2048, 1024, 512, 256, 128) if mp % t == 0]
        tk_cands = sorted({min(kp0, 2048)} |
                          {t for t in (1024, 512, 256, 128) if t < kp0},
                          reverse=True)
        best = None                                   # (score, tm, tk)
        for cand_tm in tm_cands:
            fit_tk = next((t for t in tk_cands
                           if footprint(cand_tm, t) <= budget_bytes), None)
            if fit_tk is None:
                continue
            # Prefer a K tile of at least 512, then the largest tm, then tk.
            score = (min(fit_tk, 512), cand_tm, fit_tk)
            if best is None or score > best[0]:
                best = (score, cand_tm, fit_tk)
        auto_tm, auto_tk = (best[1], best[2]) if best is not None else (128, 128)
        tm = tm if tm is not None else auto_tm
        tk = tk if tk is not None else auto_tk

    if mp % tm:
        mp = _round_up(M, tm)
    # Even M-block count so v7x's two TensorCores split the parallel axis evenly.
    if not user_tm and (mp // tm) in (1, 3) and tm > 128:
        tm //= 2
    kp = _round_up(K, tk)
    return tm, tk, mp, kp


def gated_conv3d(x, params, *, stride, padding, dilation=(1, 1, 1),
                 activation=None, out_dtype=jnp.float32, tm=None, tk=None):
    """Forward pass of GatedConv3d.  x: (N, Cin, D, H, W).

    activation: None | "tanh" | "relu" (applied to the h branch, as in the
    PyTorch module).  out_dtype=jnp.bfloat16 halves output HBM traffic when the
    consumer tolerates it; in-kernel accumulation is f32 either way."""
    wh, bh, wg, bg = params["wh"], params["bh"], params["wg"], params["bg"]
    Cout, Cin, kd, kh, kw = wh.shape
    T = kd * kh * kw
    K = Cin * T

    pT, (N, Do, Ho, Wo) = _im2col_3d_T(
        x, (kd, kh, kw), stride, padding, dilation, jnp.bfloat16)
    M = N * Do * Ho * Wo

    # Cout padded to a multiple of 16 (sublane packing for bf16 output slabs).
    Coutp = _round_up(Cout, 16)
    budget, vmem_limit = _vmem_budget()
    tm, tk, Mp, Kp = _choose_tiles(M, K, Coutp, jnp.dtype(out_dtype).itemsize,
                                   budget, tm=tm, tk=tk)

    # Zero-pad K (exact: padded rows multiply zero weights); padded M columns
    # are dead work that gets sliced off below.
    pT = jnp.pad(pT, ((0, Kp - K), (0, Mp - M)))

    def flat_w(w):
        # (Cout, Cin, kd, kh, kw) -> tap-major (Cout, T*Cin) to match pT rows.
        wf = w.reshape(Cout, Cin, T).transpose(0, 2, 1).reshape(Cout, K)
        return jnp.pad(wf, ((0, Coutp - Cout), (0, Kp - K)))

    def flat_b(b):
        return jnp.pad(b, (0, Coutp - Cout))

    w_cat = jnp.concatenate([flat_w(wh), flat_w(wg)],
                            axis=0).astype(jnp.bfloat16)        # (2*Coutp, Kp)
    b_cat = jnp.concatenate([flat_b(bh), flat_b(bg)],
                            axis=0).reshape(2 * Coutp, 1).astype(jnp.float32)

    out = _gated_matmul(pT, w_cat, b_cat, coutp=Coutp, activation=activation,
                        tm=tm, tk=tk, out_dtype=out_dtype,
                        vmem_limit_bytes=vmem_limit)            # (Coutp, Mp)
    # (Coutp, Mp) -> (Cout, N, Do, Ho, Wo) -> (N, Cout, Do, Ho, Wo)
    out = out[:Cout, :M].reshape(Cout, N, Do, Ho, Wo)
    return out.transpose(1, 0, 2, 3, 4)


def init_gated_conv3d_params(key, input_channels, output_channels,
                             kernel_size):
    """Deterministic init mirroring PyTorch Conv3d default (uniform +-1/sqrt(fan_in))."""
    kd, kh, kw = kernel_size
    fan_in = input_channels * kd * kh * kw
    bound = 1.0 / jnp.sqrt(fan_in)
    k1, k2, k3, k4 = jax.random.split(key, 4)
    shape_w = (output_channels, input_channels, kd, kh, kw)
    return {
        "wh": jax.random.uniform(k1, shape_w, jnp.float32, -bound, bound),
        "bh": jax.random.uniform(k2, (output_channels,), jnp.float32, -bound, bound),
        "wg": jax.random.uniform(k3, shape_w, jnp.float32, -bound, bound),
        "bg": jax.random.uniform(k4, (output_channels,), jnp.float32, -bound, bound),
    }


# ----------------------------- Reference check ----------------------------- #

def _reference(x, params, stride, padding, dilation, activation):
    # Reference uses the same bf16-rounded x / weights as the kernel (bias in
    # f32) so the comparison isolates the kernel math rather than the
    # deliberate bf16 input quantization.
    def rnd(a):
        return a.astype(jnp.bfloat16).astype(jnp.float32)

    xr = rnd(x)
    dn = jax.lax.conv_dimension_numbers(x.shape, params["wh"].shape,
                                        ("NCDHW", "OIDHW", "NCDHW"))

    def conv(w, b):
        y = jax.lax.conv_general_dilated(
            xr, rnd(w), window_strides=stride,
            padding=[(p, p) for p in padding],
            rhs_dilation=dilation, dimension_numbers=dn,
            precision=jax.lax.Precision.HIGHEST)
        return y + b.reshape(1, -1, 1, 1, 1)

    h = conv(params["wh"], params["bh"])
    if activation == "tanh":
        h = jnp.tanh(h)
    elif activation == "relu":
        h = jnp.maximum(h, 0.0)
    g = jax.nn.sigmoid(conv(params["wg"], params["bg"]))
    return h * g


if __name__ == "__main__":
    master_key = jax.random.PRNGKey(0)

    def run_case(seed, *, N, Cin, Cout, spatial, kernel_size, stride, padding,
                 dilation, activation, out_dtype=jnp.float32, tol=1e-2,
                 tm=None, tk=None):
        kx, kp = jax.random.split(jax.random.fold_in(master_key, seed))
        D = H = W = spatial
        x = jax.random.normal(kx, (N, Cin, D, H, W), jnp.float32)
        params = init_gated_conv3d_params(kp, Cin, Cout, kernel_size)
        out = gated_conv3d(x, params, stride=stride, padding=padding,
                           dilation=dilation, activation=activation,
                           out_dtype=out_dtype, tm=tm, tk=tk)
        out = jax.block_until_ready(out)
        ref = _reference(x, params, stride, padding, dilation, activation)
        assert out.shape == ref.shape, (out.shape, ref.shape)
        err = float(jnp.max(jnp.abs(out.astype(jnp.float32) - ref)))
        # Tolerances account for bf16 inputs + approx-EUP reciprocal in the gate
        # (and bf16 output rounding for the bf16 case).
        assert jnp.allclose(out.astype(jnp.float32), ref, atol=tol, rtol=tol), err

    # (a) Basic: stride 1, single K block, 2 parallel M blocks.
    run_case(1, N=2, Cin=4, Cout=8, spatial=8, kernel_size=(3, 3, 3),
             stride=(1, 1, 1), padding=(1, 1, 1), dilation=(1, 1, 1),
             activation=None)
    # (b) Padding paths: Cout/K/M padding, stride 2, dilation 2, tanh.
    run_case(2, N=2, Cin=3, Cout=5, spatial=9, kernel_size=(3, 3, 3),
             stride=(2, 2, 2), padding=(1, 1, 1), dilation=(2, 2, 2),
             activation="tanh")
    # (c) Multi-K-block reduction path (forced tk=128) + relu + bf16 output.
    run_case(3, N=2, Cin=10, Cout=8, spatial=6, kernel_size=(3, 3, 3),
             stride=(1, 1, 1), padding=(1, 1, 1), dilation=(1, 1, 1),
             activation="relu", out_dtype=jnp.bfloat16, tol=2.5e-2, tk=128)

    print("KERNEL_OK")
</pallas_src>

<mosaic_0001>
module attributes {stable_mosaic.version = 11 : i64} {
  func.func @_gated_conv_kernel(%arg0: i32, %arg1: i32, %arg2: memref<128x512xbf16, #tpu.memory_space<vmem>>, %arg3: memref<32x128xbf16, #tpu.memory_space<vmem>>, %arg4: memref<32x1xf32, #tpu.memory_space<vmem>>, %arg5: memref<16x512xf32, #tpu.memory_space<vmem>>, %arg6: memref<32x512xf32, #tpu.memory_space<vmem>>) attributes {dimension_semantics = [#tpu.dimension_semantics<parallel>, #tpu.dimension_semantics<arbitrary>], iteration_bounds = array<i64: 2, 1>, scalar_prefetch = 0 : i64, scratch_operands = 1 : i64, tpu.core_type = #tpu.core_type<tc>, window_params = [{transform_indices = @transform_0, window_bounds = array<i64: 128, 512>}, {transform_indices = @transform_1, window_bounds = array<i64: 32, 128>}, {pipeline_mode = #tpu.pipeline_mode<synchronous>, transform_indices = @transform_2, window_bounds = array<i64: 32, 1>}, {transform_indices = @transform_3, window_bounds = array<i64: 16, 512>}]} {
    %c0_i32 = arith.constant 0 : i32
    %0 = arith.cmpi eq, %arg1, %c0_i32 : i32
    %1 = arith.extui %0 : i1 to i32
    %c0_i32_0 = arith.constant 0 : i32
    %2 = arith.cmpi ne, %1, %c0_i32_0 : i32
    scf.if %2 {
      %cst_10 = arith.constant 0.000000e+00 : f32
      %12 = vector.broadcast %cst_10 : f32 to vector<32x512xf32>
      %c0_11 = arith.constant 0 : index
      %c0_12 = arith.constant 0 : index
      %13 = vector.load %arg6[%c0_11, %c0_12] : memref<32x512xf32, #tpu.memory_space<vmem>>, vector<32x512xf32>
      tpu.vector_store %arg6[%c0_11, %c0_12], %12 {strides = array<i32>} : memref<32x512xf32, #tpu.memory_space<vmem>>, vector<32x512xf32>,
    } else {
    }
    %c0 = arith.constant 0 : index
    %c0_1 = arith.constant 0 : index
    %3 = vector.load %arg6[%c0, %c0_1] : memref<32x512xf32, #tpu.memory_space<vmem>>, vector<32x512xf32>
    %c0_2 = arith.constant 0 : index
    %c0_3 = arith.constant 0 : index
    %4 = vector.load %arg3[%c0_2, %c0_3] : memref<32x128xbf16, #tpu.memory_space<vmem>>, vector<32x128xbf16>
    %c0_4 = arith.constant 0 : index
    %c0_5 = arith.constant 0 : index
    %5 = vector.load %arg2[%c0_4, %c0_5] : memref<128x512xbf16, #tpu.memory_space<vmem>>, vector<128x512xbf16>
    %cst = arith.constant dense<0.000000e+00> : vector<32x512xf32>
    %6 = tpu.matmul %4, %5, %cst {dimension_numbers = #tpu.dot_dimension_numbers<[1], [0], [0], [1], [0, 0, 1, 1], [], []>} : vector<32x128xbf16>, vector<128x512xbf16>, vector<32x512xf32> -> vector<32x512xf32>
    %7 = arith.addf %3, %6 : vector<32x512xf32>
    %c0_6 = arith.constant 0 : index
    %c0_7 = arith.constant 0 : index
    %8 = vector.load %arg6[%c0_6, %c0_7] : memref<32x512xf32, #tpu.memory_space<vmem>>, vector<32x512xf32>
    tpu.vector_store %arg6[%c0_6, %c0_7], %7 {strides = array<i32>} : memref<32x512xf32, #tpu.memory_space<vmem>>, vector<32x512xf32>,
    %c0_i32_8 = arith.constant 0 : i32
    %9 = arith.cmpi eq, %arg1, %c0_i32_8 : i32
    %10 = arith.extui %9 : i1 to i32
    %c0_i32_9 = arith.constant 0 : i32
    %11 = arith.cmpi ne, %10, %c0_i32_9 : i32
    scf.if %11 {
      %c0_10 = arith.constant 0 : index
      %c0_11 = arith.constant 0 : index
      %12 = vector.load %arg6[%c0_10, %c0_11] : memref<32x512xf32, #tpu.memory_space<vmem>>, vector<32x512xf32>
      %c0_12 = arith.constant 0 : index
      %c0_13 = arith.constant 0 : index
      %13 = vector.load %arg4[%c0_12, %c0_13] : memref<32x1xf32, #tpu.memory_space<vmem>>, vector<32x1xf32>
      %14 = vector.broadcast %13 : vector<32x1xf32> to vector<32x512xf32>
      %15 = arith.addf %12, %14 : vector<32x512xf32>
      %16 = vector.extract_strided_slice %15 {offsets = [0, 0], sizes = [16, 512], strides = [1, 1]} : vector<32x512xf32> to vector<16x512xf32>
      %17 = vector.extract_strided_slice %15 {offsets = [16, 0], sizes = [16, 512], strides = [1, 1]} : vector<32x512xf32> to vector<16x512xf32>
      %cst_14 = arith.constant 0.000000e+00 : f32
      %18 = vector.broadcast %cst_14 : f32 to vector<16x512xf32>
      %19 = arith.subf %18, %17 : vector<16x512xf32>
      %20 = math.exp %19 : vector<16x512xf32>
      %cst_15 = arith.constant 1.000000e+00 : f32
      %21 = vector.broadcast %cst_15 : f32 to vector<16x512xf32>
      %22 = arith.addf %21, %20 : vector<16x512xf32>
      %23 = tpu.reciprocal %22 {approx = true} : vector<16x512xf32> -> vector<16x512xf32>
      %24 = arith.mulf %16, %23 : vector<16x512xf32>
      %c0_16 = arith.constant 0 : index
      %c0_17 = arith.constant 0 : index
      %25 = vector.load %arg5[%c0_16, %c0_17] : memref<16x512xf32, #tpu.memory_space<vmem>>, vector<16x512xf32>
      tpu.vector_store %arg5[%c0_16, %c0_17], %24 {strides = array<i32>} : memref<16x512xf32, #tpu.memory_space<vmem>>, vector<16x512xf32>,
    } else {
    }
    return
  }
  func.func @transform_0(%arg0: i32, %arg1: i32) -> (i32, i32) {
    %c0_i32 = arith.constant 0 : i32
    return %arg1, %arg0 : i32, i32
  }
  func.func @transform_1(%arg0: i32, %arg1: i32) -> (i32, i32) {
    %c0_i32 = arith.constant 0 : i32
    %c0_i32_0 = arith.constant 0 : i32
    return %c0_i32, %arg1 : i32, i32
  }
  func.func @transform_2(%arg0: i32, %arg1: i32) -> (i32, i32) {
    %c0_i32 = arith.constant 0 : i32
    %c0_i32_0 = arith.constant 0 : i32
    %c0_i32_1 = arith.constant 0 : i32
    return %c0_i32, %c0_i32_0 : i32, i32
  }
  func.func @transform_3(%arg0: i32, %arg1: i32) -> (i32, i32) {
    %c0_i32 = arith.constant 0 : i32
    %c0_i32_0 = arith.constant 0 : i32
    return %c0_i32, %arg0 : i32, i32
  }
}

</mosaic_0001>

<bundles_post_ra>
// kernel: tpu_custom_call.1
= control target key start
LH: loop header
LB: loop body
LE: loop exit
PB: predicated region body
PF: predicated region fallthrough
CT: control target
= control target key end

     0   :  { %8 = vsyncpa [#allocation4], 0  ;;  %s1441_s0 = inlined_call_operand.hbm [shape: bf16[128,1024], index: 0, kind: input, shape index: {}]   ;;  %s1442_s1 = inlined_call_operand.vmem [shape: bf16[32,128], index: 1, kind: input, shape index: {}]   ;;  %s1443_s2 = inlined_call_operand.vmem [shape: f32[32,1], index: 2, kind: input, shape index: {}]   ;;  %s1444_s3 = inlined_call_operand.hbm [shape: f32[16,1024], index: 3, kind: output, shape index: {}]  }
   0x1   :  { %10 = vsyncpa [#allocation4 + $0x1], 0 }
   0x2   :  { %11 = vsyncpa [#allocation5], 0 }
   0x3   :  { %13 = vsyncpa [#allocation5 + $0x1], 0  ;;  %s1185_s12 = smov 0   ;;  %s1187_s13 = smov 0  }
   0x4   :  { %s1189_s14 = smov 0   ;;  %s1191_s15 = smov 0  }
   0x5   :  { %s1193_s16 = smov 0   ;;  %s1195_s17 = smov 0  }
   0x6 LB: > { %s837_s18 = sadd.s32 4294967295, %s1154_s17   ;;  %s838_s19 = sadd.s32 4294967294, %s1154_s17   ;;  %s1154_s17 = sphi %s1195_s17, %s19_s17   ;;  %s1150_s16 = sphi %s1193_s16, %s1458_s16   ;;  %s1146_s15 = sphi %s1191_s15, %s1457_s15   ;;  %s1142_s14 = sphi %s1189_s14, %s1456_s14   ;;  %s1138_s13 = sphi %s1187_s13, %s1455_s13   ;;  %s1134_s12 = sphi %s1185_s12, %s1454_s12  }
   0x7   : > { %s31_s20 = sadd.s32 1, %s1150_s16  ;;  %s40_s21 = sadd.s32 1, %s1142_s14 }
   0x8   : > { %p33_p0 = scmp.ge.s32.totalorder %s31_s20, 2  ;;  %p47_p1 = scmp.ne.s32.totalorder %s1142_s14, %s1138_s13 }
   0x9   : > { %p48_p2 = scmp.eq.s32.totalorder %s1154_s17, 0  ;;  %p53_p3 = scmp.ne.s32.totalorder %s1138_s13, %s1134_s12 }
   0xa   : > { %s1460_s20 = smov (%p33_p0, %s31_s20), 0  ;;  %p54_p5 = scmp.eq.s32.totalorder %s837_s18, 0 }
   0xb   : > { %p1226_p4 = por %p48_p2, %p47_p1  ;;  %s36_s23 = ssub.s32 %s1150_s16, %s1460_s20 }
   0xc   : > { %p124_p6 = scmp.eq.s32.totalorder %s837_s18, 1  ;;  %p38_p7 = scmp.eq.s32.totalorder %s36_s23, 0 }
   0xd   : > { %p1232_p8 = por %p54_p5, %p53_p3  ;;  %p130_p10 = scmp.eq.s32.totalorder %s838_s19, 1 }
   0xe   : > { %p1236_p9 = por %p124_p6, %p47_p1  ;;  %p901_p13 = scmp.lt.s32.totalorder %s1154_s17, 2 }
   0xf   : > { %s1241_s26 = scalar_select %p38_p7, %s1142_s14, %s40_s21  }
  0x10   : > { %s1448_s25 = scalar_select %p1236_p9, 1, 0 }
  0x11   : > { %p1243_p11 = por %p130_p10, %p53_p3  ;;  %s160_s28 = sand.u32 1, %s1142_s14  }
  0x12   : > { %s842_s29 = sshll.u32 %s160_s28, 8  ;;  %s887_s30 = sshll.u32 %s1150_s16, 8 }
  0x13   : > { %s1449_s27 = scalar_select %p1243_p11, 1, 0 }
  0x14   : > { %s1254_s6 = scalar_lea.hbm %s1441_s0, %s887_s30  ;;  %s164_s7 = scalar_lea.vmem [#allocation3], %s842_s29 }
  0x15   : > { %s174_s8 = sshll.u32 %s164_s7, 4  ;;  %p1260_p0 = pnand %p901_p13, %p1226_p4  ;;  %s1256_s8 = int_to_ptr.vmem [resolvable:$true] %s174_s8 }
  0x16   : > { %s1264_s10 = scalar_lea.sflag [#allocation4], %s160_s28  ;;  %s1042_s11 = scalar_lea.hbm %s1254_s6, 4096 }
  0x17   : > { %p1043_p1 = scmp.ne.s32.totalorder %s1254_s6, %s1042_s11  ;;  %p1044_p2 = pneg %p1260_p0 }
  0x18   : > { %s1047_s21 = scalar_lea.hbm %s1441_s0, 8192  ;;  %p1048_p4 = scmp.lt.u32.totalorder %s1254_s6, %s1441_s0 }
  0x19   : > { %p1045_p3 = pnand %p1044_p2, %p1043_p1  ;;  %p1049_p6 = scmp.lt.u32.totalorder %s1047_s21, %s1042_s11 }
  0x1a   : > { %p1051_p10 = scmp.lt.u32.totalorder %s1042_s11, %s1254_s6 }
  0x1b   : > { %p1046_p5 = pneg %p1045_p3  ;;  %p1050_p7 = por %p1049_p6, %p1048_p4 }
  0x1d   : > { %p1052_p13 = por %p1051_p10, %p1050_p7 }
  0x1f   : > { %p1053_p12 = pnand %p1052_p13, %p1046_p5 }
  0x21   : > { %1056 = shalt.err (!%p1053_p12)
}
  0x22   : > { %s1057_s28 = scalar_lea.vmem %s1256_s8, 4096  ;;  %s1156_s29 = smov [#allocation3]  }
  0x23   : > { %p1058_p1 = scmp.ne.s32.totalorder %s1256_s8, %s1057_s28  ;;  %s1062_s30 = sshll.u32 %s1156_s29, 4  ;;  %s1063_s30 = int_to_ptr.vmem [resolvable:$false] %s1062_s30 }
  0x24   : > { %s1064_s4 = scalar_lea.vmem %s1063_s30, 8192  ;;  %p1065_p9 = scmp.lt.s32.totalorder %s1256_s8, %s1063_s30 }
  0x25   : > { %p1060_p3 = pnand %p1058_p1, %p1044_p2  ;;  %p1066_p4 = scmp.lt.s32.totalorder %s1064_s4, %s1057_s28 }
  0x27   : > { %p1061_p11 = pneg %p1060_p3  ;;  %p1067_p6 = por %p1066_p4, %p1065_p9 }
  0x29   : > { %p1068_p7 = pnand %p1067_p6, %p1061_p11 }
  0x2b   : > { %1071 = shalt.err (!%p1068_p7)
}
  0x2c   : > { %s1157_s5 = smov 512   ;;  %s1158_s7 = smov 256  }
  0x2d   : > { %s1159_s11 = smov 16   ;;  %p845_p12 = scmp.ge.s32.totalorder %s1154_s17, 1 }
  0x2e   : > { %896 = dma.hbm_to_vmem [thread:$0]  (!%p1260_p0), %s1254_s6, 4096, %s1256_s8, %s1264_s10, %s1157_s5, %s1158_s7, %s1159_s11  }
  0x2f   : > { %p182_p2 = scmp.lt.s32.totalorder %s1154_s17, 3 }
  0x31   : > { %p183_p5 = pnand %p845_p12, %p182_p2 }
  0x32   : > { %s1295_s18 = sand.u32 (!%p183_p5), 1, %s1138_s13  }
  0x33   : > { %186 = sbr.rel (%p183_p5) target bundleno = 369 (0x171), region = 32  ;;  %s846_s19 = sshll.u32 (!%p183_p5), %s1295_s18, 8 }
  0x34   : > { %s189_s21 = scalar_lea.sflag (!%p183_p5), [#allocation4], %s1295_s18  ;;  %s1299_s22 = scalar_lea.vmem (!%p183_p5), [#allocation3], %s846_s19 }
  0x3a   : > { %1125 = dma.done.wait (%p1232_p8), %s189_s21, 4096  }
  0x3b   : > { %1127 = vsyncadd (%p1232_p8), %s189_s21, 4294963200  ;;  %v1160_v0 = vmov 0   ;;  %v960_v1 = vld [vmem:[%s1299_s22 + $0x4] ss:$16 sps:$4 sm:$0xff]   ;;  %v962_v2 = vld [vmem:[%s1299_s22 + $0xc] ss:$16 sps:$4 sm:$0xff]  }
  0x3c   : > { %503 = vmatprep.mubr.bf16.mxu0 %v1160_v0  ;;  %556 = vmatprep.mubr.bf16.mxu1 %v1160_v0  ;;  %v964_v3 = vld [vmem:[%s1299_s22] ss:$16 sps:$4 sm:$0xff]   ;;  %v965_v4 = vld [vmem:[%s1299_s22 + $0x8] ss:$16 sps:$4 sm:$0xff]   ;;  %v966_v5 = vld [vmem:[%s1299_s22 + $0x24] ss:$16 sps:$4 sm:$0xff]  }
  0x3d   : > { %959 = vset.pattern.permute.xlu1 %v1160_v0  ;;  %958 = vset.pattern.permute.xlu0 %v1160_v0  ;;  %v968_v6 = vld [vmem:[%s1299_s22 + $0x2c] ss:$16 sps:$4 sm:$0xff]   ;;  %v970_v7 = vld [vmem:[%s1299_s22 + $0x20] ss:$16 sps:$4 sm:$0xff]   ;;  %v971_v8 = vld [vmem:[%s1299_s22 + $0x28] ss:$16 sps:$4 sm:$0xff]  }
  0x3e   : > { %471 = vmatprep.subr.bf16.mxu0 %v960_v1  ;;  %524 = vmatprep.subr.bf16.mxu1 %v962_v2  ;;  %v972_v9 = vld [vmem:[%s1299_s22 + $0x44] ss:$16 sps:$4 sm:$0xff]   ;;  %v974_v10 = vld [vmem:[%s1299_s22 + $0x4c] ss:$16 sps:$4 sm:$0xff]   ;;  %v976_v11 = vld [vmem:[%s1299_s22 + $0x40] ss:$16 sps:$4 sm:$0xff]  }
  0x3f   : > { %472 = vmatpush1.bf16.msra.mxu0 %v964_v3  ;;  %525 = vmatpush1.bf16.msra.mxu1 %v965_v4  ;;  %v977_v12 = vld [vmem:[%s1299_s22 + $0x48] ss:$16 sps:$4 sm:$0xff]   ;;  %v978_v13 = vld [vmem:[%s1299_s22 + $0x64] ss:$16 sps:$4 sm:$0xff]   ;;  %v980_v14 = vld [vmem:[%s1299_s22 + $0x6c] ss:$16 sps:$4 sm:$0xff]  }
  0x40   : > { %473 = vmatprep.subr.bf16.mxu0 %v966_v5  ;;  %526 = vmatprep.subr.bf16.mxu1 %v968_v6  ;;  %v982_v15 = vld [vmem:[%s1299_s22 + $0x60] ss:$16 sps:$4 sm:$0xff]   ;;  %v983_v16 = vld [vmem:[%s1299_s22 + $0x68] ss:$16 sps:$4 sm:$0xff]   ;;  %v984_v17 = vld [vmem:[%s1299_s22 + $0x84] ss:$16 sps:$4 sm:$0xff]  }
  0x41   : > { %v986_v18 = vld [vmem:[%s1299_s22 + $0x8c] ss:$16 sps:$4 sm:$0xff]   ;;  %v988_v19 = vld [vmem:[%s1299_s22 + $0x80] ss:$16 sps:$4 sm:$0xff]   ;;  %v989_v20 = vld [vmem:[%s1299_s22 + $0x88] ss:$16 sps:$4 sm:$0xff]  }
  0x42   : > { %v990_v21 = vld [vmem:[%s1299_s22 + $0xa4] ss:$16 sps:$4 sm:$0xff]   ;;  %v992_v22 = vld [vmem:[%s1299_s22 + $0xac] ss:$16 sps:$4 sm:$0xff]   ;;  %v994_v23 = vld [vmem:[%s1299_s22 + $0xa0] ss:$16 sps:$4 sm:$0xff]  }
  0x43   : > { %474 = vmatpush1.bf16.msra.mxu0 %v970_v7  ;;  %527 = vmatpush1.bf16.msra.mxu1 %v971_v8  ;;  %v995_v24 = vld [vmem:[%s1299_s22 + $0xa8] ss:$16 sps:$4 sm:$0xff]   ;;  %v996_v25 = vld [vmem:[%s1299_s22 + $0xc4] ss:$16 sps:$4 sm:$0xff]   ;;  %v998_v26 = vld [vmem:[%s1299_s22 + $0xcc] ss:$16 sps:$4 sm:$0xff]  }
  0x44   : > { %475 = vmatprep.subr.bf16.mxu0 %v972_v9  ;;  %528 = vmatprep.subr.bf16.mxu1 %v974_v10  ;;  %v628_v27 = vld [vmem:[%s1443_s2] sm:$0xff]  ;;  %v1001_v29 = vld [vmem:[%s1299_s22 + $0xc8] ss:$16 sps:$4 sm:$0xff]   ;;  %v630_v30 = vld [vmem:[%s1443_s2 + $0x10] sm:$0xff]  ;;  %s847_s11 = sshll.u32 %s1295_s18, 6  ;;  %s888_s21 = sshll.u32 %s1146_s15, 9 }
  0x45   : > { %v1000_v28 = vld [vmem:[%s1299_s22 + $0xc0] ss:$16 sps:$4 sm:$0xff]   ;;  %v1002_v31 = vld [vmem:[%s1299_s22 + $0xe4] ss:$16 sps:$4 sm:$0xff]   ;;  %v1004_v32 = vld [vmem:[%s1299_s22 + $0xec] ss:$16 sps:$4 sm:$0xff]   ;;  %634 = vperm.xlu1 %959, %v628_v27   ;;  %644 = vperm.xlu0 %958, %v630_v30   ;;  %s1390_s6 = scalar_lea.hbm %s1444_s3, %s888_s21 }
  0x46   : > { %v629_v33 = vld [vmem:[%s1443_s2 + $0x8] sm:$0xff]  ;;  %v631_v34 = vld [vmem:[%s1443_s2 + $0x18] sm:$0xff]  ;;  %v1006_v35 = vld [vmem:[%s1299_s22 + $0xe0] ss:$16 sps:$4 sm:$0xff]   ;;  %s218_s19 = scalar_lea.vmem [#allocation6], %s847_s11  ;;  %s725_s8 = scalar_lea.sflag [#allocation5], %s1295_s18 }
  0x47   : > { %476 = vmatpush1.bf16.msra.mxu0 %v976_v11  ;;  %529 = vmatpush1.bf16.msra.mxu1 %v977_v12  ;;  %v1007_v36 = vld [vmem:[%s1299_s22 + $0xe8] ss:$16 sps:$4 sm:$0xff]   ;;  %v1008_v37 = vld [vmem:[%s1442_s1] sm:$0xff]   ;;  %s738_s22 = sshll.u32 %s218_s19, 4  ;;  %p1451_p9 = scmp.ne.s32.totalorder %s1448_s25, 0  ;;  %s1392_s22 = int_to_ptr.vmem [resolvable:$true] %s738_s22 }
  0x48   : > { %477 = vmatprep.subr.bf16.mxu0 %v978_v13  ;;  %530 = vmatprep.subr.bf16.mxu1 %v980_v14  ;;  %v1009_v38 = vld [vmem:[%s1442_s1 + $0x8] sm:$0xff]   ;;  %s1072_s9 = scalar_lea.vmem %s1392_s22, 1024  ;;  %s1161_s10 = smov [#allocation6]  }
  0x49   : > { %639 = vperm.xlu1 %959, %v629_v33   ;;  %649 = vperm.xlu0 %958, %v631_v34   ;;  %p1073_p8 = scmp.ne.s32.totalorder %s1392_s22, %s1072_s9  ;;  %s1076_s23 = sshll.u32 %s1161_s10, 4  ;;  %s1077_s23 = int_to_ptr.vmem [resolvable:$false] %s1076_s23 }
  0x4a   : > { %s1078_s28 = scalar_lea.vmem %s1077_s23, 2048  ;;  %p1079_p10 = scmp.lt.s32.totalorder %s1392_s22, %s1077_s23 }
  0x4b   : > { %478 = vmatpush1.bf16.msra.mxu0 %v982_v15  ;;  %531 = vmatpush1.bf16.msra.mxu1 %v983_v16  ;;  %p1074_p11 = pnand %p1073_p8, %p1451_p9  ;;  %p1080_p13 = scmp.lt.s32.totalorder %s1078_s28, %s1072_s9 }
  0x4c   : > { %479 = vmatprep.subr.bf16.mxu0 %v984_v17  ;;  %532 = vmatprep.subr.bf16.mxu1 %v986_v18 }
  0x4d   : > { %p1075_p0 = pneg %p1074_p11  ;;  %p1081_p1 = por %p1080_p13, %p1079_p10 }
  0x4f   : > { %480 = vmatpush1.bf16.msra.mxu0 %v988_v19  ;;  %533 = vmatpush1.bf16.msra.mxu1 %v989_v20  ;;  %p1082_p3 = pnand %p1081_p1, %p1075_p0 }
  0x50   : > { %481 = vmatprep.subr.bf16.mxu0 %v990_v21  ;;  %534 = vmatprep.subr.bf16.mxu1 %v992_v22 }
  0x53   : > { %482 = vmatpush1.bf16.msra.mxu0 %v994_v23  ;;  %535 = vmatpush1.bf16.msra.mxu1 %v995_v24 }
  0x54   : > { %483 = vmatprep.subr.bf16.mxu0 %v996_v25  ;;  %536 = vmatprep.subr.bf16.mxu1 %v998_v26 }
  0x57   : > { %484 = vmatpush1.bf16.msra.mxu0 %v1000_v28  ;;  %537 = vmatpush1.bf16.msra.mxu1 %v1001_v29 }
  0x58   : > { %485 = vmatprep.subr.bf16.mxu0 %v1002_v31  ;;  %538 = vmatprep.subr.bf16.mxu1 %v1004_v32 }
  0x5b   : > { %486 = vmatpush1.bf16.msra.mxu0 %v1006_v35  ;;  %539 = vmatpush1.bf16.msra.mxu1 %v1007_v36 }
  0x5e   : > { %504 = vmatmul.mubr.bf16.vlgmr.msra.gmra.mrb[0].mxu0 %v1008_v37  ;;  %557 = vmatmul.mubr.bf16.vlgmr.msra.gmra.mrb[0].mxu1 %v1008_v37 }
  0x5f   : > { %513 = vmatprep.mubr.bf16.mxu0 %v1160_v0  ;;  %566 = vmatprep.mubr.bf16.mxu1 %v1160_v0 }
  0x66   : > { %514 = vmatmul.mubr.bf16.gmra.mrb[4].mxu0 %v1009_v38  ;;  %567 = vmatmul.mubr.bf16.gmra.mrb[4].mxu1 %v1009_v38 }
  0xc4   : > { %v645_v39 = vpop.permute.xlu0 %644  ;;  %v635_v31 = vpop.permute.xlu1 %634 }
  0xc8   : > { %v650_v48 = vpop.permute.xlu0 %649  ;;  %v640_v37 = vpop.permute.xlu1 %639 }
 0x131   : > { %v1361_v40 = vpop.f32.mrb[0].mxu0  ;;  %v1363_v41 = vpop.f32.mrb[0].mxu1 }
 0x132   : > { %v1365_v42 = vpop.f32.mrb[1].mxu0  ;;  %v1367_v43 = vpop.f32.mrb[1].mxu1  ;;  %v652_v34 = vadd.f32 %v635_v31, %v1361_v40  ;;  %v654_v36 = vadd.f32 %v635_v31, %v1363_v41 }
 0x133   : > { %v1369_v44 = vpop.f32.mrb[2].mxu0  ;;  %v1371_v45 = vpop.f32.mrb[2].mxu1 }
 0x134   : > { %v1373_v46 = vpop.f32.mrb[3].mxu0  ;;  %v1375_v47 = vpop.f32.mrb[3].mxu1 }
 0x139   : > { %v515_v49 = vpop.f32.mrb[4].mxu0  ;;  %v568_v50 = vpop.f32.mrb[4].mxu1 }
 0x13a   : > { %v660_v51 = vadd.f32 %v645_v39, %v515_v49  ;;  %v662_v52 = vadd.f32 %v645_v39, %v568_v50  ;;  %v517_v53 = vpop.f32.mrb[5].mxu0  ;;  %v570_v54 = vpop.f32.mrb[5].mxu1  ;;  %v655_v50 = vadd.f32 %v635_v31, %v1367_v43 }
 0x13b   : > { %v661_v55 = vadd.f32 %v645_v39, %v517_v53  ;;  %v663_v56 = vadd.f32 %v645_v39, %v570_v54  ;;  %v519_v57 = vpop.f32.mrb[6].mxu0  ;;  %v572_v58 = vpop.f32.mrb[6].mxu1  ;;  %v653_v39 = vadd.f32 %v635_v31, %v1365_v42  ;;  %v656_v53 = vadd.f32 %v640_v37, %v1369_v44 }
 0x13c   : > { %v668_v59 = vsub.f32 0.0, %v660_v51  ;;  %v670_v60 = vsub.f32 0.0, %v662_v52  ;;  %v664_v61 = vadd.f32 %v650_v48, %v519_v57  ;;  %v666_v62 = vadd.f32 %v650_v48, %v572_v58  ;;  %v521_v63 = vpop.f32.mrb[7].mxu0  ;;  %v574_v0 = vpop.f32.mrb[7].mxu1 }
 0x13d   : > { %v669_v1 = vsub.f32 0.0, %v661_v55  ;;  %v671_v2 = vsub.f32 0.0, %v663_v56  ;;  %v665_v3 = vadd.f32 %v650_v48, %v521_v63  ;;  %v667_v4 = vadd.f32 %v650_v48, %v574_v0 }
 0x13e   : > { %v676_v5 = vmul.f32 1.442695, %v668_v59  ;;  %v680_v6 = vmul.f32 1.442695, %v670_v60  ;;  %v672_v7 = vsub.f32 0.0, %v664_v61  ;;  %v674_v8 = vsub.f32 0.0, %v666_v62 }
 0x13f   : > { %v678_v9 = vmul.f32 1.442695, %v669_v1  ;;  %v682_v10 = vmul.f32 1.442695, %v671_v2  ;;  %v673_v11 = vsub.f32 0.0, %v665_v3  ;;  %v675_v12 = vsub.f32 0.0, %v667_v4 }
 0x140   : > { %1010 = vpow2.f32 %v676_v5  ;;  %v684_v13 = vmul.f32 1.442695, %v672_v7  ;;  %v688_v14 = vmul.f32 1.442695, %v674_v8  ;;  %v658_v55 = vadd.f32 %v640_v37, %v1371_v45 }
 0x141   : > { %1012 = vpow2.f32 %v680_v6  ;;  %v686_v15 = vmul.f32 1.442695, %v673_v11  ;;  %v690_v16 = vmul.f32 1.442695, %v675_v12  ;;  %v657_v42 = vadd.f32 %v640_v37, %v1373_v46 }
 0x142   : > { %1014 = vpow2.f32 %v678_v9  ;;  %v659_v44 = vadd.f32 %v640_v37, %v1375_v47 }
 0x143   : > { %1016 = vpow2.f32 %v682_v10 }
 0x144   : > { %1018 = vpow2.f32 %v684_v13 }
 0x145   : > { %1020 = vpow2.f32 %v688_v14 }
 0x146   : > { %1022 = vpow2.f32 %v686_v15 }
 0x147   : > { %1024 = vpow2.f32 %v690_v16 }
 0x14a   : > { %v1011_v17 = vpop.eup %1010 }
 0x14b   : > { %v1013_v18 = vpop.eup %1012  ;;  %v692_v19 = vadd.f32 1.0, %v1011_v17 }
 0x14c   : > { %v1015_v20 = vpop.eup %1014  ;;  %v694_v21 = vadd.f32 1.0, %v1013_v18 }
 0x14d   : > { %v1017_v22 = vpop.eup %1016  ;;  %1026 = vrcp.f32 %v692_v19  ;;  %v693_v23 = vadd.f32 1.0, %v1015_v20 }
 0x14e   : > { %v1019_v24 = vpop.eup %1018  ;;  %1028 = vrcp.f32 %v694_v21  ;;  %v695_v25 = vadd.f32 1.0, %v1017_v22 }
 0x14f   : > { %v1021_v26 = vpop.eup %1020  ;;  %1030 = vrcp.f32 %v693_v23  ;;  %v696_v27 = vadd.f32 1.0, %v1019_v24 }
 0x150   : > { %v1023_v28 = vpop.eup %1022  ;;  %1032 = vrcp.f32 %v695_v25  ;;  %v698_v29 = vadd.f32 1.0, %v1021_v26 }
 0x151   : > { %v1025_v30 = vpop.eup %1024  ;;  %1034 = vrcp.f32 %v696_v27  ;;  %v697_v32 = vadd.f32 1.0, %v1023_v28 }
 0x152   : > { %1036 = vrcp.f32 %v698_v29  ;;  %v699_v33 = vadd.f32 1.0, %v1025_v30 }
 0x153   : > { %1038 = vrcp.f32 %v697_v32 }
 0x154   : > { %1040 = vrcp.f32 %v699_v33 }
 0x157   : > { %v1027_v35 = vpop.eup %1026 }
 0x158   : > { %v1029_v38 = vpop.eup %1028  ;;  %v708_v48 = vmul.f32 %v1027_v35, %v652_v34 }
 0x159   : > { %v1031_v49 = vpop.eup %1030  ;;  %v710_v51 = vmul.f32 %v1029_v38, %v654_v36 }
 0x15a   : > { %v1033_v52 = vpop.eup %1032  ;;  %716 = vst [vmem:[%s218_s19] sm:$0xff] %v708_v48  ;;  %v709_v54 = vmul.f32 %v1031_v49, %v653_v39 }
 0x15b   : > { %v1035_v40 = vpop.eup %1034  ;;  %718 = vst [vmem:[%s218_s19 + $0x10] sm:$0xff] %v710_v51  ;;  %v711_v41 = vmul.f32 %v1033_v52, %v655_v50 }
 0x15c   : > { %v1037_v56 = vpop.eup %1036  ;;  %717 = vst [vmem:[%s218_s19 + $0x8] sm:$0xff] %v709_v54  ;;  %v712_v43 = vmul.f32 %v1035_v40, %v656_v53 }
 0x15d   : > { %v1039_v57 = vpop.eup %1038  ;;  %719 = vst [vmem:[%s218_s19 + $0x18] sm:$0xff] %v711_v41  ;;  %v714_v58 = vmul.f32 %v1037_v56, %v658_v55 }
 0x15e   : > { %v1041_v45 = vpop.eup %1040  ;;  %720 = vst [vmem:[%s218_s19 + $0x20] sm:$0xff] %v712_v43  ;;  %v713_v59 = vmul.f32 %v1039_v57, %v657_v42 }
 0x15f   : > { %722 = vst [vmem:[%s218_s19 + $0x30] sm:$0xff] %v714_v58  ;;  %v715_v46 = vmul.f32 %v1041_v45, %v659_v44 }
 0x160   : > { %721 = vst [vmem:[%s218_s19 + $0x28] sm:$0xff] %v713_v59 }
 0x161   : > { %723 = vst [vmem:[%s218_s19 + $0x38] sm:$0xff] %v715_v46 }
 0x162   : > { %1085 = shalt.err (!%p1082_p3)
}
 0x163   : > { %s1086_s29 = scalar_lea.hbm %s1390_s6, 1024  ;;  %s1090_s5 = scalar_lea.hbm %s1444_s3, 2048 }
 0x164   : > { %p1087_p4 = scmp.ne.s32.totalorder %s1390_s6, %s1086_s29  ;;  %p1091_p12 = scmp.lt.u32.totalorder %s1390_s6, %s1444_s3 }
 0x165   : > { %p1092_p2 = scmp.lt.u32.totalorder %s1090_s5, %s1086_s29  ;;  %p1094_p8 = scmp.lt.u32.totalorder %s1086_s29, %s1390_s6 }
 0x166   : > { %p1088_p6 = pnand %p1087_p4, %p1451_p9 }
 0x167   : > { %p1093_p5 = por %p1092_p2, %p1091_p12 }
 0x168   : > { %p1089_p7 = pneg %p1088_p6 }
 0x169   : > { %p1095_p11 = por %p1094_p8, %p1093_p5 }
 0x16b   : > { %p1096_p0 = pnand %p1095_p11, %p1089_p7 }
 0x16d   : > { %1099 = shalt.err (!%p1096_p0)
}
 0x16e   : > { %s1162_s19 = smov 512   ;;  %s1163_s21 = smov 1024  }
 0x16f   : > { %s1164_s24 = smov 32  }
 0x170   : > { %891 = dma.vmem_to_hbm [thread:$0]  (%p1451_p9), %s1392_s22, 1024, %s1390_s6, %s725_s8, %s1162_s19, %s1163_s21, %s1164_s24  }
 0x171 PF: > { %s753_s15 = sand.u32 1, %s1134_s12   ;;  %p1452_p10 = scmp.ne.s32.totalorder %s1449_s27, 0 }
 0x172   : > { %p1453_p13 = scmp.ge.s32.totalorder %s1154_s17, 2  ;;  %s754_s9 = scalar_lea.sflag [#allocation5], %s753_s15 }
 0x174   : > { %p898_p1 = pnand %p1453_p13, %p1452_p10 }
 0x176   : > { %1129 = dma.done.wait (!%p898_p1), %s754_s9, 1024  }
 0x177   : > { %1131 = vsyncadd (!%p898_p1), %s754_s9, 4294966272  ;;  %s19_s17 = sadd.s32 1, %s1154_s17   ;;  %s1454_s12 = smov %s1138_s13 }
 0x178   : > { %p16_p3 = scmp.ge.s32.totalorder %s19_s17, 4   ;;  %s1455_s13 = smov %s1142_s14 }
 0x179   : > { %s1456_s14 = smov %s1241_s26  ;;  %s1457_s15 = smov %s1150_s16 }
 0x17a   : > { %s1458_s16 = smov %s1460_s20  ;;  %18 = sbr.rel (!%p16_p3) target bundleno = 6 (0x6), region = 88 }
 0x181   :  { %759 = vsyncpa [#allocation4], 1 }
 0x182   :  { %761 = vsyncpa [#allocation4 + $0x1], 1 }
 0x183   :  { %762 = vsyncpa [#allocation5], 1 }
 0x184   :  { %764 = vsyncpa [#allocation5 + $0x1], 1 }

</bundles_post_ra>
